<compile_context>
chip_gen: v6e
topology: v6e:2x2x1
jax: 0.10.0
libtpu: 0.0.40
codegen_flags: <defaults>
</compile_context>

<pallas_src>
import functools

import jax
import jax.numpy as jnp
from jax.experimental import pallas as pl
from jax.experimental.pallas import tpu as pltpu

BN_EPS = 1e-5


def _round_up(x, m):
    return ((x + m - 1) // m) * m


def _conv_stats_kernel(patches_ref, w1_ref, sum_ref, sumsq_ref):
    """Pass 1 (stats-only): h = patches @ W1; per-tile per-channel sum / sum(h^2)."""
    h = jnp.dot(patches_ref[...], w1_ref[...],
                preferred_element_type=jnp.float32)            # (tile_m, 256) f32
    # XLU sublane reductions (vector-extended slot); MXU/VPU stay free.
    s = jnp.sum(h, axis=0, keepdims=True)                      # (1, 256)
    ss = jnp.sum(h * h, axis=0, keepdims=True)
    sum_ref[...] = s.reshape(sum_ref.shape)                    # own (i,0,0) block
    sumsq_ref[...] = ss.reshape(sumsq_ref.shape)


def _bn_relu_proj_kernel(patches_ref, w1_ref, scale_ref, shift_ref,
                         w2_ref, b2_ref, out_ref, *, mxu_dtype):
    """Pass 2: recompute h, folded-BN affine + ReLU + 1x1 conv (+bias)."""
    h = jnp.dot(patches_ref[...], w1_ref[...],
                preferred_element_type=jnp.float32)            # (tile_m, 256) f32
    r = jnp.maximum(h * scale_ref[...] + shift_ref[...], 0.0)  # BN affine + ReLU
    out = jnp.dot(r.astype(mxu_dtype), w2_ref[...],
                  preferred_element_type=jnp.float32) + b2_ref[...]
    out_ref[...] = out.astype(out_ref.dtype)


def aux_module_forward(x_nchw, w1, gamma, beta, w2, b2, *,
                       tile_m=2048, mxu_dtype=jnp.bfloat16):
    """Forward of Aux_Module (training-mode BN, batch statistics).

    x_nchw: (N, Cin, H, W) f32; w1: (256, Cin, 3, 3); w2: (C, 256, 1, 1).
    """
    N, Cin, H, W = x_nchw.shape
    Cmid = w1.shape[0]                      # 256
    num_classes = w2.shape[0]

    M = N * H * W
    # Multiple of 16 so bf16 patch tiles stay sublane-packed.
    tile_m = _round_up(max(16, min(tile_m, _round_up(M, 16))), 16)
    M_pad = _round_up(M, tile_m)
    num_tiles = M_pad // tile_m

    K = 9 * Cin                             # kept un-padded in HBM
    C_pad = _round_up(num_classes, 128)     # lane-dense output stores
    mxu_bytes = jnp.dtype(mxu_dtype).itemsize

    # ---- glue: NCHW -> NHWC, pad, im2col (pure layout work) ----
    x = jnp.transpose(x_nchw, (0, 2, 3, 1))                    # (N, H, W, Cin)
    xp = jnp.pad(x, ((0, 0), (1, 1), (1, 1), (0, 0)))
    cols = []
    for dy in range(3):
        for dx in range(3):
            cols.append(xp[:, dy:dy + H, dx:dx + W, :])
    patches = jnp.concatenate(cols, axis=-1).reshape(M, K)
    # Zero rows (M padding) contribute nothing to the BN sums (conv has no bias).
    patches = jnp.pad(patches, ((0, M_pad - M), (0, 0))).astype(mxu_dtype)

    # ---- glue: weights to matmul form ----
    # row index of w1_mat = (dy*3+dx)*Cin + cin  (matches patch col-order)
    w1_mat = jnp.transpose(w1, (2, 3, 1, 0)).reshape(K, Cmid).astype(mxu_dtype)
    w2_mat = jnp.transpose(w2.reshape(num_classes, Cmid), (1, 0))
    w2_mat = jnp.pad(w2_mat, ((0, 0), (0, C_pad - num_classes))).astype(mxu_dtype)
    b2_pad = jnp.pad(b2, (0, C_pad - num_classes)).reshape(1, C_pad).astype(jnp.float32)

    # ---------------- pass 1: 3x3 conv -> per-tile BN statistics ----------------
    cost1 = pl.CostEstimate(
        flops=2 * M_pad * K * Cmid + 3 * M_pad * Cmid,
        transcendentals=0,
        bytes_accessed=(M_pad * K + K * Cmid) * mxu_bytes
                       + 2 * num_tiles * Cmid * 4)
    sum_part, sumsq_part = pl.pallas_call(
        _conv_stats_kernel,
        out_shape=(jax.ShapeDtypeStruct((num_tiles, 1, Cmid), jnp.float32),
                   jax.ShapeDtypeStruct((num_tiles, 1, Cmid), jnp.float32)),
        grid_spec=pltpu.PrefetchScalarGridSpec(
            num_scalar_prefetch=0,
            grid=(num_tiles,),
            in_specs=[pl.BlockSpec((tile_m, K), lambda i: (i, 0)),
                      pl.BlockSpec((K, Cmid), lambda i: (0, 0))],
            out_specs=(pl.BlockSpec((1, 1, Cmid), lambda i: (i, 0, 0)),
                       pl.BlockSpec((1, 1, Cmid), lambda i: (i, 0, 0)))),
        compiler_params=pltpu.CompilerParams(
            dimension_semantics=("parallel",),      # per-tile partials -> no race
            vmem_limit_bytes=32 << 20),
        cost_estimate=cost1,
    )(patches, w1_mat)

    # ---- tiny wrapper math: combine partials, fold BN into scale/shift ----
    csum = jnp.sum(sum_part, axis=(0, 1))                      # (Cmid,) f32
    csumsq = jnp.sum(sumsq_part, axis=(0, 1))
    mean = csum / M
    var = jnp.maximum(csumsq / M - mean * mean, 0.0)
    # TODO(synk): for extreme |mean|/std ratios a Welford-style combine of the
    # per-tile partials would be more robust than E[h^2]-mean^2.
    scale = (gamma.astype(jnp.float32) * jax.lax.rsqrt(var + BN_EPS))
    shift = beta.astype(jnp.float32) - mean * scale
    scale2 = scale.reshape(1, Cmid)
    shift2 = shift.reshape(1, Cmid)

    # ------------- pass 2: recompute h, folded BN + ReLU + 1x1 conv -------------
    cost2 = pl.CostEstimate(
        flops=2 * M_pad * K * Cmid + 2 * M_pad * Cmid * C_pad + 3 * M_pad * Cmid,
        transcendentals=0,
        bytes_accessed=(M_pad * K + K * Cmid + Cmid * C_pad) * mxu_bytes
                       + M_pad * C_pad * 4 + 3 * Cmid * 4 + C_pad * 4)
    out_pad = pl.pallas_call(
        functools.partial(_bn_relu_proj_kernel, mxu_dtype=mxu_dtype),
        out_shape=jax.ShapeDtypeStruct((M_pad, C_pad), jnp.float32),
        grid_spec=pltpu.PrefetchScalarGridSpec(
            num_scalar_prefetch=0,
            grid=(num_tiles,),
            in_specs=[pl.BlockSpec((tile_m, K), lambda i: (i, 0)),
                      pl.BlockSpec((K, Cmid), lambda i: (0, 0)),
                      pl.BlockSpec((1, Cmid), lambda i: (0, 0)),   # scale
                      pl.BlockSpec((1, Cmid), lambda i: (0, 0)),   # shift
                      pl.BlockSpec((Cmid, C_pad), lambda i: (0, 0)),
                      pl.BlockSpec((1, C_pad), lambda i: (0, 0))],
            out_specs=pl.BlockSpec((tile_m, C_pad), lambda i: (i, 0))),
        compiler_params=pltpu.CompilerParams(
            dimension_semantics=("parallel",),      # both TCs on v7x
            vmem_limit_bytes=32 << 20),
        cost_estimate=cost2,
    )(patches, w1_mat, scale2, shift2, w2_mat, b2_pad)

    out = out_pad[:M, :num_classes].reshape(N, H, W, num_classes)
    return jnp.transpose(out, (0, 3, 1, 2))


def _reference(x, w1, gamma, beta, w2, b2):
    """Pure-JAX reference of the PyTorch forward (training-mode BN)."""
    dn = ("NCHW", "OIHW", "NCHW")
    h = jax.lax.conv_general_dilated(x, w1, (1, 1), "SAME", dimension_numbers=dn)
    mean = jnp.mean(h, axis=(0, 2, 3), keepdims=True)
    var = jnp.mean((h - mean) ** 2, axis=(0, 2, 3), keepdims=True)
    hn = (h - mean) / jnp.sqrt(var + BN_EPS) * gamma.reshape(1, -1, 1, 1) \
         + beta.reshape(1, -1, 1, 1)
    r = jnp.maximum(hn, 0.0)
    out = jax.lax.conv_general_dilated(r, w2, (1, 1), "VALID", dimension_numbers=dn)
    return out + b2.reshape(1, -1, 1, 1)


if __name__ == "__main__":
    key = jax.random.PRNGKey(0)
    N, Cin, H, W = 2, 4, 16, 16
    Cmid, num_classes = 256, 19

    k1, k2, k3, k4, k5, k6 = jax.random.split(key, 6)
    x = jax.random.normal(k1, (N, Cin, H, W), jnp.float32)
    w1 = jax.random.normal(k2, (Cmid, Cin, 3, 3), jnp.float32) * 0.1
    gamma = 1.0 + 0.1 * jax.random.normal(k3, (Cmid,), jnp.float32)
    beta = 0.1 * jax.random.normal(k4, (Cmid,), jnp.float32)
    w2 = jax.random.normal(k5, (num_classes, Cmid, 1, 1), jnp.float32) * 0.1
    b2 = 0.1 * jax.random.normal(k6, (num_classes,), jnp.float32)

    ref = _reference(x, w1, gamma, beta, w2, b2)

    # f32 MXU path, small tile -> exercises a 4-step grid with per-tile stats.
    out_f32 = aux_module_forward(x, w1, gamma, beta, w2, b2,
                                 tile_m=128, mxu_dtype=jnp.float32)
    out_f32 = jax.block_until_ready(out_f32)
    assert out_f32.shape == (N, num_classes, H, W), out_f32.shape
    err_f32 = float(jnp.max(jnp.abs(out_f32 - ref)))
    assert jnp.allclose(out_f32, ref, atol=2e-3, rtol=2e-3), err_f32

    # bf16 MXU path, default (large) tile_m -> single-tile fast path.
    out_bf16 = aux_module_forward(x, w1, gamma, beta, w2, b2,
                                  mxu_dtype=jnp.bfloat16)
    out_bf16 = jax.block_until_ready(out_bf16)
    assert out_bf16.shape == (N, num_classes, H, W), out_bf16.shape
    err_bf16 = float(jnp.max(jnp.abs(out_bf16 - ref)))
    assert jnp.allclose(out_bf16, ref, atol=1.5e-1, rtol=5e-2), err_bf16

    print("KERNEL_OK")
</pallas_src>

<mosaic_0001>
module attributes {stable_mosaic.version = 11 : i64} {
  func.func @_conv_stats_kernel(%arg0: i32, %arg1: memref<128x36xf32, #tpu.memory_space<vmem>>, %arg2: memref<36x256xf32, #tpu.memory_space<vmem>>, %arg3: memref<1x1x256xf32, #tpu.memory_space<vmem>>, %arg4: memref<1x1x256xf32, #tpu.memory_space<vmem>>) attributes {dimension_semantics = [#tpu.dimension_semantics<parallel>], iteration_bounds = array<i64: 4>, scalar_prefetch = 0 : i64, scratch_operands = 0 : i64, tpu.core_type = #tpu.core_type<tc>, window_params = [{transform_indices = @transform_0, window_bounds = array<i64: 128, 36>}, {pipeline_mode = #tpu.pipeline_mode<synchronous>, transform_indices = @transform_1, window_bounds = array<i64: 36, 256>}, {transform_indices = @transform_2, window_bounds = array<i64: 1, 1, 256>}, {transform_indices = @transform_3, window_bounds = array<i64: 1, 1, 256>}]} {
    %c0 = arith.constant 0 : index
    %c0_0 = arith.constant 0 : index
    %0 = vector.load %arg1[%c0, %c0_0] : memref<128x36xf32, #tpu.memory_space<vmem>>, vector<128x36xf32>
    %c0_1 = arith.constant 0 : index
    %c0_2 = arith.constant 0 : index
    %1 = vector.load %arg2[%c0_1, %c0_2] : memref<36x256xf32, #tpu.memory_space<vmem>>, vector<36x256xf32>
    %cst = arith.constant dense<0.000000e+00> : vector<128x256xf32>
    %2 = tpu.matmul %0, %1, %cst {dimension_numbers = #tpu.dot_dimension_numbers<[1], [0], [0], [1], [0, 0, 1, 1], [], []>} : vector<128x36xf32>, vector<36x256xf32>, vector<128x256xf32> -> vector<128x256xf32>
    %cst_3 = arith.constant dense<0.000000e+00> : vector<256xf32>
    %3 = vector.multi_reduction <add>, %2, %cst_3 [0] : vector<128x256xf32> to vector<256xf32>
    %4 = vector.shape_cast %3 : vector<256xf32> to vector<1x256xf32>
    %5 = arith.mulf %2, %2 : vector<128x256xf32>
    %cst_4 = arith.constant dense<0.000000e+00> : vector<256xf32>
    %6 = vector.multi_reduction <add>, %5, %cst_4 [0] : vector<128x256xf32> to vector<256xf32>
    %7 = vector.shape_cast %6 : vector<256xf32> to vector<1x256xf32>
    %8 = vector.shape_cast %4 : vector<1x256xf32> to vector<1x1x256xf32>
    %c0_5 = arith.constant 0 : index
    %c0_6 = arith.constant 0 : index
    %c0_7 = arith.constant 0 : index
    %9 = vector.load %arg3[%c0_5, %c0_6, %c0_7] : memref<1x1x256xf32, #tpu.memory_space<vmem>>, vector<1x1x256xf32>
    tpu.vector_store %arg3[%c0_5, %c0_6, %c0_7], %8 {strides = array<i32>} : memref<1x1x256xf32, #tpu.memory_space<vmem>>, vector<1x1x256xf32>,
    %10 = vector.shape_cast %7 : vector<1x256xf32> to vector<1x1x256xf32>
    %c0_8 = arith.constant 0 : index
    %c0_9 = arith.constant 0 : index
    %c0_10 = arith.constant 0 : index
    %11 = vector.load %arg4[%c0_8, %c0_9, %c0_10] : memref<1x1x256xf32, #tpu.memory_space<vmem>>, vector<1x1x256xf32>
    tpu.vector_store %arg4[%c0_8, %c0_9, %c0_10], %10 {strides = array<i32>} : memref<1x1x256xf32, #tpu.memory_space<vmem>>, vector<1x1x256xf32>,
    return
  }
  func.func @transform_0(%arg0: i32) -> (i32, i32) {
    %c0_i32 = arith.constant 0 : i32
    %c0_i32_0 = arith.constant 0 : i32
    return %arg0, %c0_i32 : i32, i32
  }
  func.func @transform_1(%arg0: i32) -> (i32, i32) {
    %c0_i32 = arith.constant 0 : i32
    %c0_i32_0 = arith.constant 0 : i32
    %c0_i32_1 = arith.constant 0 : i32
    return %c0_i32, %c0_i32_0 : i32, i32
  }
  func.func @transform_2(%arg0: i32) -> (i32, i32, i32) {
    %c0_i32 = arith.constant 0 : i32
    %c0_i32_0 = arith.constant 0 : i32
    %c0_i32_1 = arith.constant 0 : i32
    return %arg0, %c0_i32, %c0_i32_0 : i32, i32, i32
  }
  func.func @transform_3(%arg0: i32) -> (i32, i32, i32) {
    %c0_i32 = arith.constant 0 : i32
    %c0_i32_0 = arith.constant 0 : i32
    %c0_i32_1 = arith.constant 0 : i32
    return %arg0, %c0_i32, %c0_i32_0 : i32, i32, i32
  }
}

</mosaic_0001>

<bundles_post_ra>
// kernel: tpu_custom_call.1
= control target key start
LH: loop header
LB: loop body
LE: loop exit
PB: predicated region body
PF: predicated region fallthrough
CT: control target
= control target key end

     0   :  { %9 = vsyncpa [#allocation3], 0  ;;  %s1188_s0 = inlined_call_operand.vmem [shape: f32[512,36], index: 0, kind: input, shape index: {}]   ;;  %s1189_s1 = inlined_call_operand.vmem [shape: f32[36,256], index: 1, kind: input, shape index: {}]   ;;  %s1190_s2 = inlined_call_operand.hbm [shape: f32[4,1,256], index: 2, kind: output, shape index: {0}]   ;;  %s1191_s3 = inlined_call_operand.hbm [shape: f32[4,1,256], index: 3, kind: output, shape index: {1}]  }
   0x1   :  { %11 = vsyncpa [#allocation3 + $0x1], 0 }
   0x2   :  { %12 = vsyncpa [#allocation5], 0 }
   0x3   :  { %14 = vsyncpa [#allocation5 + $0x1], 0  ;;  %s916_s12 = smov 0   ;;  %s918_s13 = smov 0  }
   0x4   :  { %s920_s14 = smov 0   ;;  %s922_s15 = smov 0  }
   0x5 LB: > { %s937_s16 = sadd.s32 4294967295, %s890_s15   ;;  %s708_s17 = sadd.s32 4294967294, %s890_s15   ;;  %s890_s15 = sphi %s922_s15, %s1199_s15   ;;  %s886_s14 = sphi %s920_s14, %s1198_s14   ;;  %s882_s13 = sphi %s918_s13, %s1197_s13   ;;  %s878_s12 = sphi %s916_s12, %s1196_s12  }
   0x6   : > { %s941_s18 = sadd.s32 1, %s890_s15   ;;  %s74_s19 = sadd.s32 1, %s886_s14 }
   0x7   : > { %s71_s20 = ssub.s32 %s890_s15, %s941_s18  ;;  %p84_p0 = scmp.ne.s32.totalorder %s886_s14, %s882_s13 }
   0x8   : > { %p72_p1 = scmp.eq.s32.totalorder %s71_s20, 0  ;;  %p85_p2 = scmp.eq.s32.totalorder %s937_s16, 3 }
   0x9   : > { %p90_p3 = scmp.ne.s32.totalorder %s882_s13, %s878_s12  ;;  %p91_p4 = scmp.eq.s32.totalorder %s708_s17, 3 }
   0xa   : > { %s952_s21 = scalar_select %p72_p1, %s886_s14, %s74_s19  }
   0xb   : > { %p954_p5 = por %p85_p2, %p84_p0  ;;  %p958_p6 = por %p91_p4, %p90_p3 }
   0xc   : > { %p711_p7 = scmp.ge.s32.totalorder %s890_s15, 1  ;;  %p147_p8 = scmp.lt.s32.totalorder %s890_s15, 5 }
   0xe   : > { %p148_p9 = pnand %p711_p7, %p147_p8 }
   0xf   : > { %s714_s5 = sshll.u32 (!%p148_p9), %s937_s16, 4  ;;  %s1099_s4 = sand.u32 (!%p148_p9), 1, %s882_s13  }
  0x10   : > { %151 = sbr.rel (%p148_p9) target bundleno = 326 (0x146), region = 28  ;;  %p177_p10 = scmp.lt.s32.totalorder (!%p148_p9), %s714_s5, 63 }
  0x11   : > { %s742_s6 = sshll.u32 (!%p148_p9), %s937_s16, 5  ;;  %s894_s27 = smov (!%p148_p9), [#allocation2]  }
  0x12   : > { %s1113_s19 = scalar_lea.hbm (!%p148_p9), %s1190_s2, %s742_s6  ;;  %s1122_s24 = scalar_lea.hbm (!%p148_p9), %s1191_s3, %s742_s6 }
  0x13   : > { %s804_s28 = sshll.u32 (!%p148_p9), %s894_s27, 4  ;;  %s805_s28 = int_to_ptr.vmem [resolvable:$false] %s804_s28 }
  0x14   : > { %s806_s29 = scalar_lea.vmem (!%p148_p9), %s805_s28, 64 }
  0x15   : > { %v207_v0 = vld [vmem:[%s1189_s1 + $0x48] sm:$0xf]  ;;  %vm257_vm0 = vcmask 1043456   ;;  %v206_v1 = vld [vmem:[%s1189_s1 + $0x40] sm:$0xf]  ;;  %v205_v2 = vld [vmem:[%s1189_s1 + $0x38] sm:$0xff] }
  0x16   : > { %716 = vmatprep.subr.msk.mxu0 %vm257_vm0, %v207_v0  ;;  %v204_v3 = vld [vmem:[%s1189_s1 + $0x30] sm:$0xff]  ;;  %744 = vmatprep.subr.msk.mxu1 %vm257_vm0, %v207_v0  ;;  %v203_v4 = vld [vmem:[%s1189_s1 + $0x28] sm:$0xff]  ;;  %v892_v5 = vmov 0.0   ;;  %v202_v6 = vld [vmem:[%s1189_s1 + $0x20] sm:$0xff]  ;;  %s1201_s5 = smov (!%p177_p10, %s714_s5), 63  ;;  %vm208_vm1 = vcmask 293888  }
  0x17   : > { %717 = vmatpush1.msk.msra.mxu0 %vm257_vm0, %v206_v1  ;;  %328 = vmatprep.mubr.f32.mxu0 %v892_v5  ;;  %v201_v7 = vld [vmem:[%s1189_s1 + $0x18] sm:$0xff]  ;;  %v200_v8 = vld [vmem:[%s1189_s1 + $0x10] sm:$0xff]  ;;  %v199_v9 = vld [vmem:[%s1189_s1 + $0x8] sm:$0xff]  ;;  %s715_s25 = sshll.u32 %s1201_s5, 3  ;;  %s712_s5 = sshll.u32 %s1099_s4, 1 }
  0x18   : > { %288 = vmatprep.subr.mxu0 %v205_v2  ;;  %749 = vmatpush1.msk.msra.mxu1 %vm257_vm0, %v206_v1  ;;  %v198_v10 = vld [vmem:[%s1189_s1] sm:$0xff]  ;;  %s999_s30 = scalar_lea.vmem %s1188_s0, %s715_s25  ;;  %s168_s7 = scalar_lea.vmem [#allocation2], %s712_s5 }
  0x19   : > { %289 = vmatpush1.msra.mxu0 %v204_v3  ;;  %745 = vmatprep.subr.mxu1 %v205_v2  ;;  %v182_v11 = vld [vmem:[%s999_s30] sm:$0xff]  ;;  %v183_v13 = vld [vmem:[%s999_s30 + $0x8] sm:$0xff]  ;;  %v184_v15 = vld [vmem:[%s999_s30 + $0x10] sm:$0xff]  ;;  %s603_s8 = sshll.u32 %s168_s7, 4  ;;  %s1107_s9 = scalar_lea.vmem [#allocation4], %s712_s5  ;;  %s1115_s8 = int_to_ptr.vmem [resolvable:$true] %s603_s8 }
  0x1a   : > { %290 = vmatprep.subr.mxu0 %v203_v4  ;;  %750 = vmatpush1.msra.mxu1 %v204_v3  ;;  %v190_v12 = vld [vmem:[%s999_s30 + $0x40] sm:$0xff]  ;;  %v191_v14 = vld [vmem:[%s999_s30 + $0x48] sm:$0xff]  ;;  %v192_v16 = vld [vmem:[%s999_s30 + $0x50] sm:$0xff]  ;;  %s617_s10 = sshll.u32 %s1107_s9, 4  ;;  %s584_s25 = scalar_lea.sflag [#allocation3], %s1099_s4  ;;  %s1124_s10 = int_to_ptr.vmem [resolvable:$true] %s617_s10 }
  0x1b   : > { %291 = vmatpush1.msra.mxu0 %v202_v6  ;;  %746 = vmatprep.subr.mxu1 %v203_v4  ;;  %v185_v17 = vld [vmem:[%s999_s30 + $0x18] sm:$0xff]  ;;  %v186_v19 = vld [vmem:[%s999_s30 + $0x20] sm:$0xff]  ;;  %v187_v21 = vld [vmem:[%s999_s30 + $0x28] sm:$0xff]  ;;  %s800_s26 = scalar_lea.vmem %s1115_s8, 32  ;;  %p807_p0 = scmp.lt.s32.totalorder %s1115_s8, %s805_s28 }
  0x1c   : > { %292 = vmatprep.subr.mxu0 %v201_v7  ;;  %751 = vmatpush1.msra.mxu1 %v202_v6  ;;  %v193_v18 = vld [vmem:[%s999_s30 + $0x58] sm:$0xff]  ;;  %v194_v20 = vld [vmem:[%s999_s30 + $0x60] sm:$0xff]  ;;  %v195_v22 = vld [vmem:[%s999_s30 + $0x68] sm:$0xff]  ;;  %p801_p11 = scmp.ne.s32.totalorder %s1115_s8, %s800_s26  ;;  %p808_p1 = scmp.lt.s32.totalorder %s806_s29, %s800_s26 }
  0x1d   : > { %293 = vmatpush1.msra.mxu0 %v200_v8  ;;  %747 = vmatprep.subr.mxu1 %v201_v7  ;;  %v188_v23 = vld [vmem:[%s999_s30 + $0x30] sm:$0xff]  ;;  %v189_v25 = vld [vmem:[%s999_s30 + $0x38] sm:$0xff] }
  0x1e   : > { %294 = vmatprep.subr.mxu0 %v199_v9  ;;  %752 = vmatpush1.msra.mxu1 %v200_v8  ;;  %v196_v24 = vld [vmem:[%s999_s30 + $0x70] sm:$0xff]  ;;  %v197_v26 = vld [vmem:[%s999_s30 + $0x78] sm:$0xff]  ;;  %p802_p12 = pnand %p801_p11, %p954_p5  ;;  %p809_p2 = por %p808_p1, %p807_p0 }
  0x1f   : > { %295 = vmatpush1.msra.mxu0 %v198_v10  ;;  %748 = vmatprep.subr.mxu1 %v199_v9 }
  0x20   : > { %718 = vmatmul.mubr.msk.f32.vlgmr.msra.gmra.mxu0 %vm208_vm1, %v182_v11  ;;  %753 = vmatpush1.msra.mxu1 %v198_v10  ;;  %p803_p13 = pneg %p802_p12 }
  0x21   : > { %334 = vmatprep.mubr.f32.mxu0 %v892_v5  ;;  %376 = vmatprep.mubr.f32.mxu1 %v892_v5 }
  0x22   : > { %726 = vmatmul.mubr.msk.f32.vlgmr.msra.gmra.mxu1 %vm208_vm1, %v190_v12  ;;  %p810_p3 = pnand %p809_p2, %p803_p13 }
  0x23   : > { %382 = vmatprep.mubr.f32.mxu1 %v892_v5 }
  0x24   : > { %719 = vmatmul.mubr.msk.f32.gmra.mxu0 %vm208_vm1, %v183_v13 }
  0x25   : > { %340 = vmatprep.mubr.f32.mxu0 %v892_v5 }
  0x26   : > { %727 = vmatmul.mubr.msk.f32.gmra.mxu1 %vm208_vm1, %v191_v14 }
  0x27   : > { %388 = vmatprep.mubr.f32.mxu1 %v892_v5 }
  0x28   : > { %720 = vmatmul.mubr.msk.f32.gmra.mxu0 %vm208_vm1, %v184_v15 }
  0x29   : > { %346 = vmatprep.mubr.f32.mxu0 %v892_v5 }
  0x2a   : > { %728 = vmatmul.mubr.msk.f32.gmra.mxu1 %vm208_vm1, %v192_v16 }
  0x2b   : > { %394 = vmatprep.mubr.f32.mxu1 %v892_v5 }
  0x2c   : > { %721 = vmatmul.mubr.msk.f32.gmra.mxu0 %vm208_vm1, %v185_v17 }
  0x2d   : > { %352 = vmatprep.mubr.f32.mxu0 %v892_v5 }
  0x2e   : > { %729 = vmatmul.mubr.msk.f32.gmra.mxu1 %vm208_vm1, %v193_v18 }
  0x2f   : > { %400 = vmatprep.mubr.f32.mxu1 %v892_v5 }
  0x30   : > { %722 = vmatmul.mubr.msk.f32.gmra.mxu0 %vm208_vm1, %v186_v19 }
  0x31   : > { %358 = vmatprep.mubr.f32.mxu0 %v892_v5 }
  0x32   : > { %730 = vmatmul.mubr.msk.f32.gmra.mxu1 %vm208_vm1, %v194_v20 }
  0x33   : > { %406 = vmatprep.mubr.f32.mxu1 %v892_v5 }
  0x34   : > { %723 = vmatmul.mubr.msk.f32.gmra.mxu0 %vm208_vm1, %v187_v21 }
  0x35   : > { %364 = vmatprep.mubr.f32.mxu0 %v892_v5 }
  0x36   : > { %731 = vmatmul.mubr.msk.f32.gmra.mxu1 %vm208_vm1, %v195_v22 }
  0x37   : > { %412 = vmatprep.mubr.f32.mxu1 %v892_v5 }
  0x38   : > { %724 = vmatmul.mubr.msk.f32.gmra.mxu0 %vm208_vm1, %v188_v23 }
  0x39   : > { %370 = vmatprep.mubr.f32.mxu0 %v892_v5 }
  0x3a   : > { %732 = vmatmul.mubr.msk.f32.gmra.mxu1 %vm208_vm1, %v196_v24 }
  0x3b   : > { %418 = vmatprep.mubr.f32.mxu1 %v892_v5 }
  0x3c   : > { %725 = vmatmul.mubr.msk.f32.gmra.mxu0 %vm208_vm1, %v189_v25 }
  0x3e   : > { %733 = vmatmul.mubr.msk.f32.gmra.mxu1 %vm208_vm1, %v197_v26 }
  0xe0   : > { %v330_v27 = vpop.f32.mrf.mxu0 }
  0xe1   : > { %v467_v46 = vmul.f32 %v330_v27, %v330_v27 }
  0xe2   : > { %v332_v28 = vpop.f32.mrf.mxu0  ;;  %v1048_v29 = vpop.f32.mrf.mxu1 }
  0xe3   : > { %v468_v49 = vmul.f32 %v332_v28, %v332_v28 }
  0xe4   : > { %v336_v30 = vpop.f32.mrf.mxu0  ;;  %v1050_v31 = vpop.f32.mrf.mxu1 }
  0xe5   : > { %v469_v42 = vmul.f32 %v336_v30, %v336_v30  ;;  %v425_v47 = vadd.f32 %v336_v30, %v330_v27  ;;  %v483_v30 = vmul.f32 %v1048_v29, %v1048_v29 }
  0xe6   : > { %v338_v32 = vpop.f32.mrf.mxu0  ;;  %v1052_v33 = vpop.f32.mrf.mxu1 }
  0xe7   : > { %v470_v43 = vmul.f32 %v338_v32, %v338_v32  ;;  %v499_v53 = vadd.f32 %v469_v42, %v467_v46  ;;  %v446_v54 = vadd.f32 %v338_v32, %v332_v28  ;;  %v485_v46 = vmul.f32 %v1052_v33, %v1052_v33 }
  0xe8   : > { %v342_v34 = vpop.f32.mrf.mxu0  ;;  %v1054_v35 = vpop.f32.mrf.mxu1 }
  0xe9   : > { %v471_v48 = vmul.f32 %v342_v34, %v342_v34  ;;  %v426_v55 = vadd.f32 %v425_v47, %v342_v34  ;;  %v520_v57 = vadd.f32 %v470_v43, %v468_v49 }
  0xea   : > { %v344_v36 = vpop.f32.mrf.mxu0  ;;  %v1056_v37 = vpop.f32.mrf.mxu1 }
  0xeb   : > { %v472_v50 = vmul.f32 %v344_v36, %v344_v36  ;;  %v500_v61 = vadd.f32 %v499_v53, %v471_v48  ;;  %v447_v62 = vadd.f32 %v446_v54, %v344_v36 }
  0xec   : > { %v348_v38 = vpop.f32.mrf.mxu0  ;;  %v1058_v39 = vpop.f32.mrf.mxu1 }
  0xed   : > { %v473_v56 = vmul.f32 %v348_v38, %v348_v38  ;;  %v427_v63 = vadd.f32 %v426_v55, %v348_v38  ;;  %v521_v1 = vadd.f32 %v520_v57, %v472_v50 }
  0xee   : > { %v350_v40 = vpop.f32.mrf.mxu0  ;;  %v1060_v41 = vpop.f32.mrf.mxu1 }
  0xef   : > { %v474_v58 = vmul.f32 %v350_v40, %v350_v40  ;;  %v501_v4 = vadd.f32 %v500_v61, %v473_v56  ;;  %v448_v5 = vadd.f32 %v447_v62, %v350_v40 }
  0xf0   : > { %v354_v44 = vpop.f32.mrf.mxu0  ;;  %v1062_v45 = vpop.f32.mrf.mxu1 }
  0xf1   : > { %v475_v0 = vmul.f32 %v354_v44, %v354_v44  ;;  %v428_v6 = vadd.f32 %v427_v63, %v354_v44  ;;  %v522_v9 = vadd.f32 %v521_v1, %v474_v58  ;;  %v484_v44 = vmul.f32 %v1050_v31, %v1050_v31 }
  0xf2   : > { %v356_v51 = vpop.f32.mrf.mxu0  ;;  %v1064_v52 = vpop.f32.mrf.mxu1  ;;  %v490_v63 = vmul.f32 %v1062_v45, %v1062_v45 }
  0xf3   : > { %v476_v2 = vmul.f32 %v356_v51, %v356_v51  ;;  %v502_v12 = vadd.f32 %v501_v4, %v475_v0  ;;  %v449_v13 = vadd.f32 %v448_v5, %v356_v51  ;;  %v486_v51 = vmul.f32 %v1054_v35, %v1054_v35 }
  0xf4   : > { %v360_v59 = vpop.f32.mrf.mxu0  ;;  %v1066_v60 = vpop.f32.mrf.mxu1 }
  0xf5   : > { %v477_v7 = vmul.f32 %v360_v59, %v360_v59  ;;  %v429_v14 = vadd.f32 %v428_v6, %v360_v59  ;;  %v523_v16 = vadd.f32 %v522_v9, %v476_v2  ;;  %v492_v4 = vmul.f32 %v1066_v60, %v1066_v60 }
  0xf6   : > { %v362_v3 = vpop.f32.mrf.mxu0  ;;  %v408_v8 = vpop.f32.mrf.mxu1 }
  0xf7   : > { %v478_v10 = vmul.f32 %v362_v3, %v362_v3  ;;  %v503_v18 = vadd.f32 %v502_v12, %v477_v7  ;;  %v450_v19 = vadd.f32 %v449_v13, %v362_v3 }
  0xf8   : > { %v366_v11 = vpop.f32.mrf.mxu0  ;;  %v410_v22 = vpop.f32.mrf.mxu1 }
  0xf9   : > { %v479_v15 = vmul.f32 %v366_v11, %v366_v11  ;;  %v430_v20 = vadd.f32 %v429_v14, %v366_v11  ;;  %v524_v23 = vadd.f32 %v523_v16, %v478_v10  ;;  %v494_v9 = vmul.f32 %v410_v22, %v410_v22 }
  0xfa   : > { %v368_v17 = vpop.f32.mrf.mxu0  ;;  %v414_v43 = vpop.f32.mrf.mxu1 }
  0xfb   : > { %v480_v21 = vmul.f32 %v368_v17, %v368_v17  ;;  %v504_v25 = vadd.f32 %v503_v18, %v479_v15  ;;  %v451_v26 = vadd.f32 %v450_v19, %v368_v17  ;;  %v495_v10 = vmul.f32 %v414_v43, %v414_v43 }
  0xfc   : > { %v372_v24 = vpop.f32.mrf.mxu0  ;;  %v416_v57 = vpop.f32.mrf.mxu1 }
  0xfd   : > { %v431_v27 = vadd.f32 %v430_v20, %v372_v24  ;;  %v481_v28 = vmul.f32 %v372_v24, %v372_v24  ;;  %v525_v32 = vadd.f32 %v524_v23, %v480_v21 }
  0xfe   : > { %v374_v34 = vpop.f32.mrf.mxu0  ;;  %v420_v3 = vpop.f32.mrf.mxu1 }
  0xff   : > { %v432_v36 = vadd.f32 %v431_v27, %v1048_v29  ;;  %v505_v38 = vadd.f32 %v504_v25, %v481_v28  ;;  %v452_v40 = vadd.f32 %v451_v26, %v374_v34  ;;  %v482_v42 = vmul.f32 %v374_v34, %v374_v34 }
 0x100   : > { %v487_v29 = vmul.f32 %v1056_v37, %v1056_v37  ;;  %v497_v11 = vmul.f32 %v420_v3, %v420_v3  ;;  %v422_v15 = vpop.f32.mrf.mxu1  ;;  %v893_v28 = vmov 1966171168  }
 0x101   : > { %v433_v47 = vadd.f32 %v432_v36, %v1052_v33  ;;  %v506_v48 = vadd.f32 %v505_v38, %v483_v30  ;;  %v453_v49 = vadd.f32 %v452_v40, %v1050_v31  ;;  %v526_v50 = vadd.f32 %v525_v32, %v482_v42 }
 0x102   : > { %v488_v33 = vmul.f32 %v1058_v39, %v1058_v39  ;;  %v489_v31 = vmul.f32 %v1060_v41, %v1060_v41  ;;  %v498_v20 = vmul.f32 %v422_v15, %v422_v15  ;;  %v545_v30 = vunpack.c.l.s4 %v893_v28 }
 0x103   : > { %v507_v53 = vadd.f32 %v506_v48, %v485_v46  ;;  %v454_v54 = vadd.f32 %v453_v49, %v1054_v35  ;;  %v527_v55 = vadd.f32 %v526_v50, %v484_v44  ;;  %v434_v56 = vadd.f32 %v433_v47, %v1056_v37 }
 0x104   : > { %v491_v35 = vmul.f32 %v1064_v52, %v1064_v52  ;;  %v546_v46 = vunpack.c.0.s8 %v545_v30 }
 0x105   : > { %v528_v58 = vadd.f32 %v527_v55, %v486_v51  ;;  %v435_v59 = vadd.f32 %v434_v56, %v1060_v41  ;;  %v508_v61 = vadd.f32 %v507_v53, %v487_v29  ;;  %v455_v62 = vadd.f32 %v454_v54, %v1058_v39 }
 0x106   : > { %v493_v41 = vmul.f32 %v408_v8, %v408_v8 }
 0x107   : > { %v436_v37 = vadd.f32 %v435_v59, %v1064_v52  ;;  %v509_v0 = vadd.f32 %v508_v61, %v489_v31  ;;  %v456_v1 = vadd.f32 %v455_v62, %v1062_v45  ;;  %v529_v2 = vadd.f32 %v528_v58, %v488_v33 }
 0x108   : > { %v496_v45 = vmul.f32 %v416_v57, %v416_v57 }
 0x109   : > { %v510_v5 = vadd.f32 %v509_v0, %v491_v35  ;;  %v457_v39 = vadd.f32 %v456_v1, %v1066_v60  ;;  %v530_v6 = vadd.f32 %v529_v2, %v490_v63  ;;  %v437_v7 = vadd.f32 %v436_v37, %v408_v8 }
 0x10b   : > { %v531_v12 = vadd.f32 %v530_v6, %v492_v4  ;;  %v511_v13 = vadd.f32 %v510_v5, %v493_v41  ;;  %v458_v52 = vadd.f32 %v457_v39, %v410_v22  ;;  %v438_v14 = vadd.f32 %v437_v7, %v414_v43 }
 0x10c   : > { %v547_v22 = vlaneseq }
 0x10d   : > { %v532_v16 = vadd.f32 %v531_v12, %v494_v9  ;;  %v512_v17 = vadd.f32 %v511_v13, %v495_v10  ;;  %v459_v18 = vadd.f32 %v458_v52, %v416_v57  ;;  %v439_v19 = vadd.f32 %v438_v14, %v420_v3 }
 0x10e   : > { %v548_v47 = vshrl.u32 %v547_v22, 7  ;;  %vm1103_vm2 = vcmp.lt.s32.totalorder %v547_v22, 256 }
 0x10f   : > { %v533_v21 = vadd.f32 %v532_v16, %v496_v45  ;;  %v440_v23 = vrot.slane %v439_v19, 4  ;;  %v513_v24 = vadd.f32 %v512_v17, %v497_v11  ;;  %v460_v60 = vadd.f32 %v459_v18, %v422_v15 }
 0x110   : > { %v549_v33 = vsub.s32 %v546_v46, %v548_v47 }
 0x111   : > { %v441_v8 = vadd.f32 %v440_v23, %v439_v19  ;;  %v514_v25 = vrot.slane %v513_v24, 4  ;;  %v461_v26 = vrot.slane %v460_v60, 4  ;;  %v534_v27 = vadd.f32 %v533_v21, %v498_v20 }
 0x113   : > { %v442_v32 = vrot.slane %v441_v8, 2  ;;  %v515_v34 = vadd.f32 %v514_v25, %v513_v24  ;;  %v462_v36 = vadd.f32 %v461_v26, %v460_v60  ;;  %v535_v38 = vrot.slane %v534_v27, 4 }
 0x115   : > { %v443_v40 = vadd.f32 %v442_v32, %v441_v8  ;;  %v516_v42 = vrot.slane %v515_v34, 2  ;;  %v463_v43 = vrot.slane %v462_v36, 2  ;;  %v536_v44 = vadd.f32 %v535_v38, %v534_v27 }
 0x117   : > { %v444_v48 = vrot.slane %v443_v40, 1  ;;  %v517_v49 = vadd.f32 %v516_v42, %v515_v34  ;;  %v464_v50 = vadd.f32 %v463_v43, %v462_v36  ;;  %v537_v51 = vrot.slane %v536_v44, 2 }
 0x119   : > { %v518_v29 = vrot.slane %v517_v49, 1  ;;  %v465_v53 = vrot.slane %v464_v50, 1  ;;  %v538_v54 = vadd.f32 %v537_v51, %v536_v44  ;;  %v445_v55 = vadd.f32 %v444_v48, %v443_v40 }
 0x11b   : > { %v466_v56 = vadd.f32 %v465_v53, %v464_v50  ;;  %v539_v57 = vrot.slane %v538_v54, 1  ;;  %v519_v31 = vadd.f32 %v518_v29, %v517_v49 }
 0x11d   : > { %v540_v58 = vadd.f32 %v539_v57, %v538_v54  ;;  %v543_v59 = vcombine.low %v445_v55, %v466_v56 }
 0x11f   : > { %v566_v61 = vcombine.low %v519_v31, %v540_v58  ;;  %v550_v62 = vrot.slane %v543_v59, %v549_v33 }
 0x121   : > { %v557_v35 = vrot.slane %v550_v62, %v549_v33  ;;  %v573_v37 = vrot.slane %v566_v61, %v549_v33 }
 0x123   : > { %563 = vst.msk [vmem:[%s168_s7] sm:$0x3] %vm1103_vm2, %v557_v35  ;;  %v580_v0 = vrot.slane %v573_v37, %v549_v33 }
 0x124   : > { %813 = shalt.err (!%p810_p3)
}
 0x125   : > { %s814_s30 = scalar_lea.hbm %s1113_s19, 32  ;;  %s818_s7 = scalar_lea.hbm %s1190_s2, 128 }
 0x126   : > { %p815_p4 = scmp.ne.s32.totalorder %s1113_s19, %s814_s30  ;;  %p819_p9 = scmp.lt.s32.totalorder %s1113_s19, %s1190_s2 }
 0x127   : > { %p820_p10 = scmp.lt.s32.totalorder %s818_s7, %s814_s30 }
 0x128   : > { %p816_p7 = pnand %p815_p4, %p954_p5 }
 0x129   : > { %p821_p11 = por %p820_p10, %p819_p9 }
 0x12a   : > { %p817_p8 = pneg %p816_p7 }
 0x12c   : > { %p822_p12 = pnand %p821_p11, %p817_p8 }
 0x12e   : > { %825 = shalt.err (!%p822_p12)
}
 0x12f   : > { %754 = dma.vmem_to_hbm [thread:$0]  (%p954_p5), %s1115_s8, 32, %s1113_s19, %s584_s25   ;;  %582 = vst.msk [vmem:[%s1107_s9] sm:$0x3] %vm1103_vm2, %v580_v0 }
 0x130   : > { %s589_s16 = scalar_lea.sflag [#allocation5], %s1099_s4  ;;  %s826_s20 = scalar_lea.vmem %s1124_s10, 32 }
 0x131   : > { %p827_p13 = scmp.ne.s32.totalorder %s1124_s10, %s826_s20  ;;  %s895_s26 = smov [#allocation4]  }
 0x132   : > { %s830_s27 = sshll.u32 %s895_s26, 4  ;;  %s831_s27 = int_to_ptr.vmem [resolvable:$false] %s830_s27 }
 0x133   : > { %p828_p0 = pnand %p827_p13, %p954_p5  ;;  %s832_s28 = scalar_lea.vmem %s831_s27, 64 }
 0x134   : > { %p833_p2 = scmp.lt.s32.totalorder %s1124_s10, %s831_s27  ;;  %p834_p3 = scmp.lt.s32.totalorder %s832_s28, %s826_s20 }
 0x135   : > { %p829_p1 = pneg %p828_p0 }
 0x136   : > { %p835_p4 = por %p834_p3, %p833_p2 }
 0x138   : > { %p836_p7 = pnand %p835_p4, %p829_p1 }
 0x13a   : > { %839 = shalt.err (!%p836_p7)
}
 0x13b   : > { %s840_s8 = scalar_lea.hbm %s1122_s24, 32  ;;  %s844_s19 = scalar_lea.hbm %s1191_s3, 128 }
 0x13c   : > { %p841_p8 = scmp.ne.s32.totalorder %s1122_s24, %s840_s8  ;;  %p845_p11 = scmp.lt.s32.totalorder %s1122_s24, %s1191_s3 }
 0x13d   : > { %p846_p12 = scmp.lt.s32.totalorder %s844_s19, %s840_s8 }
 0x13e   : > { %p842_p9 = pnand %p841_p8, %p954_p5 }
 0x13f   : > { %p847_p13 = por %p846_p12, %p845_p11 }
 0x140   : > { %p843_p10 = pneg %p842_p9 }
 0x142   : > { %p848_p0 = pnand %p847_p13, %p843_p10 }
 0x144   : > { %851 = shalt.err (!%p848_p0)
}
 0x145   : > { %755 = dma.vmem_to_hbm [thread:$0]  (%p954_p5), %s1124_s10, 32, %s1122_s24, %s589_s16  }
 0x146 PF: > { %p765_p1 = scmp.ge.s32.totalorder %s890_s15, 2  ;;  %s629_s30 = sand.u32 1, %s878_s12  }
 0x147   : > { %s630_s5 = scalar_lea.sflag [#allocation3], %s629_s30 }
 0x148   : > { %p759_p2 = pnand %p765_p1, %p958_p6 }
 0x14a   : > { %p760_p3 = pneg %p759_p2 }
 0x14c   : > { %869 = dma.done.wait (%p760_p3), %s630_s5, 32  }
 0x14d   : > { %871 = vsyncadd (%p760_p3), %s630_s5, 4294967264  ;;  %s639_s6 = scalar_lea.sflag [#allocation5], %s629_s30 }
 0x14e   : > { %873 = dma.done.wait (%p760_p3), %s639_s6, 32  }
 0x14f   : > { %875 = vsyncadd (%p760_p3), %s639_s6, 4294967264  ;;  %p17_p5 = scmp.ge.s32.totalorder %s941_s18, 6   ;;  %s1196_s12 = smov %s882_s13 }
 0x150   : > { %s1197_s13 = smov %s886_s14  ;;  %s1198_s14 = smov %s952_s21 }
 0x151   : > { %s1199_s15 = smov %s941_s18  ;;  %19 = sbr.rel (!%p17_p5) target bundleno = 5 (0x5), region = 80 }
 0x156   :  { %644 = vsyncpa [#allocation3], 1 }
 0x157   :  { %646 = vsyncpa [#allocation3 + $0x1], 1 }
 0x158   :  { %647 = vsyncpa [#allocation5], 1 }
 0x159   :  { %649 = vsyncpa [#allocation5 + $0x1], 1 }

</bundles_post_ra>
